<compile_context>
chip_gen: v5e
topology: v5e:2x2
jax: 0.10.0
libtpu: 0.0.40
codegen_flags: <defaults>
</compile_context>

<pallas_src>
import jax
import jax.numpy as jnp
from jax.experimental import pallas as pl
from jax.experimental.pallas import tpu as pltpu


_TARGET_BLOCK_BYTES = 2 * 1024 * 1024   # ~2 MiB per block (~85%+ of HBM roofline)


def _swish_kernel(beta_ref, x_ref, o_ref):
    """Swish on one (tile_rows, lanes) tile: x * sigmoid(x * beta)."""
    beta = beta_ref[0]                       # scalar resident in SMEM
    x = x_ref[...].astype(jnp.float32)       # f32 VPU/EUP math (v5e has no bf16)
    # exp() goes to the EUP; exact sigmoid keeps bit-level parity with the
    # reference (the approx-reciprocal EUP trick buys ~0% while DMA-bound).
    o_ref[...] = (x * jax.nn.sigmoid(x * beta)).astype(o_ref.dtype)


def _round_up(x, m):
    return ((x + m - 1) // m) * m


def _sublane_min(dtype):
    # Minimum second-minor tile: (8,128) f32, (16,128) bf16, (32,128) int8/fp8.
    return max(8, 32 // jnp.dtype(dtype).itemsize)


def _launch(x2d, beta_arr, tile_rows, *, alias_input):
    rows, lanes = x2d.shape
    itemsize = jnp.dtype(x2d.dtype).itemsize
    n = rows * lanes
    return pl.pallas_call(
        _swish_kernel,
        out_shape=jax.ShapeDtypeStruct((rows, lanes), x2d.dtype),
        grid_spec=pltpu.PrefetchScalarGridSpec(
            num_scalar_prefetch=0,
            grid=(pl.cdiv(rows, tile_rows),),     # ragged last block is fine
            in_specs=[
                # beta: whole (1,) array resident in SMEM, no per-step DMA.
                pl.BlockSpec(memory_space=pltpu.MemorySpace.SMEM),
                # x: lane-dense row tiles, full-width contiguous DMAs.
                pl.BlockSpec((tile_rows, lanes), lambda i: (i, 0)),
            ],
            out_specs=pl.BlockSpec((tile_rows, lanes), lambda i: (i, 0)),
        ),
        compiler_params=pltpu.CompilerParams(
            dimension_semantics=("parallel",)),
        cost_estimate=pl.CostEstimate(
            flops=3 * n, transcendentals=n, bytes_accessed=2 * n * itemsize),
        input_output_aliases=({1: 0} if alias_input else {}),
    )(beta_arr, x2d)


def _swish_impl(x, beta, *, donate_input=False):
    """Swish (x * sigmoid(beta * x)) for an arbitrarily shaped float array."""
    orig_shape = x.shape
    n = x.size
    sub = _sublane_min(x.dtype)
    itemsize = jnp.dtype(x.dtype).itemsize
    beta_arr = jnp.asarray(beta, jnp.float32).reshape((1,))

    # ---- choose a lane-dense 2-D view (zero-copy whenever possible) --------
    fast = (n % 128 == 0) and (n >= sub * 128)
    if fast:
        lanes = 128
        for cand in (1024, 512, 256):            # largest 128-multiple dividing n
            if n % cand == 0 and n // cand >= sub:
                lanes = cand
                break
        rows = n // lanes
        x2d = x.reshape(rows, lanes)             # pure relayout, no copy
    else:
        # Rare path (size not a 128-multiple, or tiny tensor): pad only to the
        # next multiple of `lanes` (plus one minimal (sub,128) tile for inputs
        # smaller than that), then slice the pad back off.
        lanes = 128
        n_pad = max(_round_up(n, lanes), sub * lanes)
        rows = n_pad // lanes
        flat = jnp.ravel(x)
        flat = jnp.pad(flat, (0, n_pad - n))     # swish(0)==0; sliced off below
        x2d = flat.reshape(rows, lanes)

    # ---- pick the row tile (~2 MiB blocks, dtype-aware sublane multiple) ---
    target_rows = max(sub, (_TARGET_BLOCK_BYTES // (lanes * itemsize)) // sub * sub)
    tile_rows = min(target_rows, (rows // sub) * sub)     # never exceed rows
    if rows >= 2 * sub:
        # Guarantee >= 2 grid steps so v7x megacore can shard the row axis.
        tile_rows = min(tile_rows, _round_up(pl.cdiv(rows, 2), sub))
    tile_rows = max(sub, tile_rows)

    out2d = _launch(x2d, beta_arr, tile_rows,
                    alias_input=(donate_input and fast))

    if fast:
        return out2d.reshape(orig_shape)         # free, no slice
    return out2d.reshape(-1)[:n].reshape(orig_shape)


# jit so the wrapper-side reshapes fuse away (zero-copy fast path end to end).
swish = jax.jit(_swish_impl, static_argnames=("donate_input",))


def swish_reference(x, beta):
    """Plain-JAX reference matching the PyTorch module semantics."""
    xf = x.astype(jnp.float32)
    return (xf * jax.nn.sigmoid(xf * jnp.float32(beta))).astype(x.dtype)


if __name__ == "__main__":
    key = jax.random.PRNGKey(0)
    k1, k2, k3 = jax.random.split(key, 3)

    # Primary case: small 4-D activation tensor (zero-copy fast path).
    x = jax.random.normal(k1, (2, 4, 16, 16), dtype=jnp.float32)
    for beta in (jnp.float32(1.0), jnp.float32(0.7)):   # torch init + "learned"
        y = jax.block_until_ready(swish(x, beta))
        y_ref = swish_reference(x, beta)
        assert y.shape == x.shape and y.dtype == x.dtype
        assert jnp.allclose(y, y_ref, atol=1e-6, rtol=1e-6), "mismatch (f32 fast path)"

    # Size not a multiple of 128 -> minimal-padding slow path.
    x_odd = jax.random.normal(k2, (3, 5, 7), dtype=jnp.float32)
    y_odd = jax.block_until_ready(swish(x_odd, jnp.float32(1.3)))
    assert jnp.allclose(y_odd, swish_reference(x_odd, jnp.float32(1.3)),
                        atol=1e-6, rtol=1e-6), "mismatch (padded path)"

    # bf16 input exercises the dtype-aware (16,128) sublane minimum.
    x_bf16 = jax.random.normal(k3, (4, 8, 64), dtype=jnp.float32).astype(jnp.bfloat16)
    y_bf16 = jax.block_until_ready(swish(x_bf16, jnp.float32(0.9)))
    assert y_bf16.dtype == jnp.bfloat16
    assert jnp.allclose(y_bf16.astype(jnp.float32),
                        swish_reference(x_bf16, jnp.float32(0.9)).astype(jnp.float32),
                        atol=2e-2, rtol=2e-2), "mismatch (bf16)"

    # Multi-block case: grid splits into >=2 steps (v7x megacore sharding).
    x_big = jax.random.normal(k1, (4, 32, 128), dtype=jnp.float32)
    y_big = jax.block_until_ready(swish(x_big, jnp.float32(1.0)))
    assert jnp.allclose(y_big, swish_reference(x_big, jnp.float32(1.0)),
                        atol=1e-6, rtol=1e-6), "mismatch (multi-block)"

    print("KERNEL_OK")
</pallas_src>

<mosaic_0001>
module attributes {stable_mosaic.version = 11 : i64} {
  func.func @_swish_kernel(%arg0: i32, %arg1: memref<1xf32, #tpu.memory_space<smem>>, %arg2: memref<8x256xf32, #tpu.memory_space<vmem>>, %arg3: memref<8x256xf32, #tpu.memory_space<vmem>>) attributes {dimension_semantics = [#tpu.dimension_semantics<parallel>], iteration_bounds = array<i64: 1>, scalar_prefetch = 0 : i64, scratch_operands = 0 : i64, tpu.core_type = #tpu.core_type<tc>, window_params = [{transform_indices = @transform_0, window_bounds = array<i64: 1>}, {transform_indices = @transform_1, window_bounds = array<i64: 8, 256>}, {transform_indices = @transform_2, window_bounds = array<i64: 8, 256>}]} {
    %c0 = arith.constant 0 : index
    %0 = memref.load %arg1[%c0] : memref<1xf32, #tpu.memory_space<smem>>
    %c0_0 = arith.constant 0 : index
    %c0_1 = arith.constant 0 : index
    %1 = vector.load %arg2[%c0_0, %c0_1] : memref<8x256xf32, #tpu.memory_space<vmem>>, vector<8x256xf32>
    %2 = vector.broadcast %0 : f32 to vector<8x256xf32>
    %3 = arith.mulf %1, %2 : vector<8x256xf32>
    %4 = arith.negf %3 : vector<8x256xf32>
    %5 = math.exp %4 : vector<8x256xf32>
    %cst = arith.constant 1.000000e+00 : f32
    %6 = vector.broadcast %cst : f32 to vector<8x256xf32>
    %7 = arith.addf %6, %5 : vector<8x256xf32>
    %8 = arith.divf %6, %7 : vector<8x256xf32>
    %9 = arith.mulf %1, %8 : vector<8x256xf32>
    %c0_2 = arith.constant 0 : index
    %c0_3 = arith.constant 0 : index
    %10 = vector.load %arg3[%c0_2, %c0_3] : memref<8x256xf32, #tpu.memory_space<vmem>>, vector<8x256xf32>
    tpu.vector_store %arg3[%c0_2, %c0_3], %9 {strides = array<i32>} : memref<8x256xf32, #tpu.memory_space<vmem>>, vector<8x256xf32>,
    return
  }
  func.func @transform_0(%arg0: i32) -> i32 {
    %c0_i32 = arith.constant 0 : i32
    %c0_i32_0 = arith.constant 0 : i32
    return %c0_i32 : i32
  }
  func.func @transform_1(%arg0: i32) -> (i32, i32) {
    %c0_i32 = arith.constant 0 : i32
    %c0_i32_0 = arith.constant 0 : i32
    return %arg0, %c0_i32 : i32, i32
  }
  func.func @transform_2(%arg0: i32) -> (i32, i32) {
    %c0_i32 = arith.constant 0 : i32
    %c0_i32_0 = arith.constant 0 : i32
    return %arg0, %c0_i32 : i32, i32
  }
}

</mosaic_0001>

<bundles_post_ra>
// kernel: _swish_impl.1
= control target key start
LH: loop header
LB: loop body
LE: loop exit
PB: predicated region body
PF: predicated region fallthrough
CT: control target
= control target key end

     0   :  { %s104_s0 = inlined_call_operand.<no memory space> [shape: f32[1], index: 0, kind: input, shape index: {}]   ;;  %s105_s1 = inlined_call_operand.vmem [shape: f32[8,256], index: 1, kind: input, shape index: {}]   ;;  %s106_s2 = inlined_call_operand.vmem [shape: f32[8,256], index: 2, kind: output, shape index: {}]  }
   0x1   :  { %v13_v0 = vld [vmem:[%s105_s1] sm:$0xff]  ;;  %v15_v1 = vstv %s104_s0  ;;  %v14_v2 = vld [vmem:[%s105_s1 + $0x8] sm:$0xff] }
   0x2   :  { %v16_v3 = vmul.f32 %v15_v1, %v13_v0  ;;  %v17_v4 = vmul.f32 %v15_v1, %v14_v2 }
   0x4   :  { %v64_v5 = vmul.f32 -1.442695, %v16_v3  ;;  %v65_v6 = vmul.f32 -1.442695, %v17_v4 }
   0x6   :  { %66 = vpow2.f32 %v64_v5 }
   0x7   :  { %68 = vpow2.f32 %v65_v6 }
   0xc   :  { %v67_v7 = vpop.eup %66 }
   0xd   :  { %v69_v8 = vpop.eup %68  ;;  %v24_v9 = vadd.f32 1.0, %v67_v7 }
   0xe   :  { %v25_v10 = vadd.f32 1.0, %v69_v8 }
   0xf   :  { %70 = vrcp.f32 %v24_v9  ;;  %vm31_vm0 = vweird.f32 %v24_v9  ;;  %v37_v14 = vand.u32 2147483648, %v24_v9  ;;  %v35_v17 = vand.u32 2147483647, %v24_v9 }
  0x10   :  { %72 = vrcp.f32 %v25_v10  ;;  %v52_v18 = vand.u32 2147483648, %v25_v10  ;;  %vm46_vm2 = vweird.f32 %v25_v10  ;;  %v50_v20 = vand.u32 2147483647, %v25_v10 }
  0x11   :  { %v38_v22 = vor.u32 1.1754944e-38, %v37_v14  ;;  %vm36_vm5 = vcmp.eq.f32.partialorder %v35_v17, 8.507059e+37 }
  0x12   :  { %v53_v25 = vor.u32 1.1754944e-38, %v52_v18  ;;  %vm51_vm7 = vcmp.eq.f32.partialorder %v50_v20, 8.507059e+37 }
  0x15   :  { %v71_v11 = vpop.eup %70 }
  0x16   :  { %v73_v12 = vpop.eup %72  ;;  %v27_v13 = vmul.f32 %v71_v11, %v24_v9  ;;  %vm32_vm1 = vweird.f32 %v71_v11 }
  0x17   :  { %v42_v15 = vmul.f32 %v73_v12, %v25_v10  ;;  %vm47_vm3 = vweird.f32 %v73_v12  ;;  %vm33_vm4 = vmor %vm31_vm0, %vm32_vm1 }
  0x18   :  { %v28_v16 = vsub.f32 1.0, %v27_v13  ;;  %vm48_vm6 = vmor %vm46_vm2, %vm47_vm3 }
  0x19   :  { %v43_v19 = vsub.f32 1.0, %v42_v15 }
  0x1a   :  { %v29_v21 = vmul.f32 %v71_v11, %v28_v16 }
  0x1b   :  { %v44_v23 = vmul.f32 %v73_v12, %v43_v19 }
  0x1c   :  { %v30_v24 = vadd.f32 %v71_v11, %v29_v21 }
  0x1d   :  { %v45_v26 = vadd.f32 %v73_v12, %v44_v23 }
  0x1e   :  { %v34_v27 = vsel %vm33_vm4, %v71_v11, %v30_v24 }
  0x1f   :  { %v39_v28 = vsel %vm36_vm5, %v38_v22, %v34_v27  ;;  %v49_v29 = vsel %vm48_vm6, %v73_v12, %v45_v26 }
  0x20   :  { %v56_v30 = vmul.f32 %v39_v28, %v13_v0  ;;  %v54_v31 = vsel %vm51_vm7, %v53_v25, %v49_v29 }
  0x21   :  { %v57_v32 = vmul.f32 %v54_v31, %v14_v2 }
  0x22   :  { %58 = vst [vmem:[%s106_s2] sm:$0xff] %v56_v30 }
  0x23   :  { %59 = vst [vmem:[%s106_s2 + $0x8] sm:$0xff] %v57_v32 }

</bundles_post_ra>
